<compile_context>
chip_gen: v7x
topology: tpu7x:2x2x1
jax: 0.10.0
libtpu: 0.0.40
codegen_flags: <defaults>
</compile_context>

<pallas_src>
import functools

import jax
import jax.numpy as jnp
from jax.experimental import pallas as pl
from jax.experimental.pallas import tpu as pltpu


def _ffn_kernel(x_ref, w1_ref, b1_ref, w2_ref, b2_ref, o_ref):
    # One batch tile per grid step: two small MXU matmuls + EUP sigmoid in VMEM.
    x = x_ref[...]
    h = jnp.dot(x, w1_ref[...], preferred_element_type=jnp.float32)
    h = h + b1_ref[...].astype(jnp.float32)
    h = jax.nn.sigmoid(h)                        # f32, on the EUP slot
    h = h.astype(w2_ref.dtype)                   # match MXU operand dtypes
    y = jnp.dot(h, w2_ref[...], preferred_element_type=jnp.float32)
    y = y + b2_ref[...].astype(jnp.float32)
    o_ref[...] = y.astype(o_ref.dtype)


@functools.partial(jax.jit, static_argnames=("tile_b", "core_parallel"))
def ffn_forward(x, w1, b1, w2, b2, *, tile_b=512, core_parallel=False):
    """x: (B, dim); w1: (dim, 5); b1: (1, 5); w2: (5, dim); b2: (1, dim).

    Output dtype == x.dtype (pass bf16 inputs for bf16 HBM I/O; compute is f32).
    """
    B, dim = x.shape
    hidden = w1.shape[1]

    # Pad hidden 5 -> 8 (sublane multiple). Exact: padded w2 rows are zero, so
    # the padded sigmoid(0)=0.5 columns contribute exactly 0 to the output.
    hp = max(8, -(-hidden // 8) * 8)
    if hp != hidden:
        pad = hp - hidden
        w1 = jnp.pad(w1, ((0, 0), (0, pad)))
        b1 = jnp.pad(b1, ((0, 0), (0, pad)))
        w2 = jnp.pad(w2, ((0, pad), (0, 0)))

    x_bytes = x.dtype.itemsize
    o_bytes = x.dtype.itemsize
    w_bytes = w1.dtype.itemsize

    # ---- tile_b selection (all static / shape-derived at trace time) ----
    tile_b = min(int(tile_b), B)
    if tile_b < B:
        tile_b = max(8, (tile_b // 8) * 8)       # (8,128) sublane constraint

    # VMEM budget: double-buffered x-tile + out-tile must stay well within the
    # smallest target (v5e 16 MiB default scoped; v7x 64 MiB physical).
    budget = 24 * (1 << 20)
    bytes_per_row = 2 * dim * (x_bytes + o_bytes)          # x2 = double buffer
    max_rows = max(8, (budget // bytes_per_row) // 8 * 8)
    tile_b = min(tile_b, max_rows)

    # Megacore: ensure >= 2 grid steps so v7x can shard the batch axis over
    # both TensorCores (harmless on v5e/v6e).
    if B >= 16 and pl.cdiv(B, tile_b) == 1:
        half = -(-B // 2)                                   # ceil(B/2)
        tile_b = min(tile_b, -(-half // 8) * 8)             # round up to 8
    grid_b = pl.cdiv(B, tile_b)

    weight_bytes = (dim * hp + hp + hp * dim + dim) * w_bytes
    vmem_needed = 2 * tile_b * dim * (x_bytes + o_bytes) + 2 * weight_bytes + (2 << 20)
    vmem_limit = int(min(64 * (1 << 20), max(vmem_needed, 16 * (1 << 20))))

    cost = pl.CostEstimate(
        flops=4 * B * dim * hp,                  # two matmuls, 2 flops per MAC
        transcendentals=B * hp,                  # exp inside sigmoid
        bytes_accessed=B * dim * (x_bytes + o_bytes) + weight_bytes,
    )

    batch_sem = pltpu.CORE_PARALLEL if core_parallel else "parallel"

    return pl.pallas_call(
        _ffn_kernel,
        out_shape=jax.ShapeDtypeStruct((B, dim), x.dtype),
        grid=(grid_b,),
        in_specs=[
            # x: streamed over batch (double-buffered by default).
            pl.BlockSpec((tile_b, dim), lambda i: (i, 0)),
            # Weights/biases: VMEM-resident, single pipeline buffer (never re-DMA'd).
            pl.BlockSpec((dim, hp), lambda i: (0, 0), pipeline_mode=pl.Buffered(1)),
            pl.BlockSpec((1, hp), lambda i: (0, 0), pipeline_mode=pl.Buffered(1)),
            pl.BlockSpec((hp, dim), lambda i: (0, 0), pipeline_mode=pl.Buffered(1)),
            pl.BlockSpec((1, dim), lambda i: (0, 0), pipeline_mode=pl.Buffered(1)),
        ],
        out_specs=pl.BlockSpec((tile_b, dim), lambda i: (i, 0)),
        compiler_params=pltpu.CompilerParams(
            dimension_semantics=(batch_sem,),
            vmem_limit_bytes=vmem_limit,
        ),
        cost_estimate=cost,
    )(x, w1, b1, w2, b2)


def init_params(key, dim, hidden=5, dtype=jnp.float32):
    """Deterministic init matching nn.Linear's U(-1/sqrt(fan_in), 1/sqrt(fan_in))."""
    k1, k2, k3, k4 = jax.random.split(key, 4)
    bound1 = 1.0 / jnp.sqrt(dim)
    bound2 = 1.0 / jnp.sqrt(hidden)
    # Stored as (in, out) == transpose of torch's (out, in) weight.
    w1 = jax.random.uniform(k1, (dim, hidden), dtype, -bound1, bound1)
    b1 = jax.random.uniform(k2, (1, hidden), dtype, -bound1, bound1)
    w2 = jax.random.uniform(k3, (hidden, dim), dtype, -bound2, bound2)
    b2 = jax.random.uniform(k4, (1, dim), dtype, -bound2, bound2)
    return w1, b1, w2, b2


if __name__ == "__main__":
    key = jax.random.PRNGKey(0)
    kx, kt, kp = jax.random.split(key, 3)

    batch, dim = 512, 128                      # dim multiple of 128 -> lane-dense stores
    x = jax.random.normal(kx, (batch, dim), jnp.float32)
    t = jax.random.normal(kt, (batch,), jnp.float32)  # unused by forward, parity only

    w1, b1, w2, b2 = init_params(kp, dim)

    # Reference (same math as the PyTorch module) in plain JAX.
    ref = jax.nn.sigmoid(x @ w1 + b1) @ w2 + b2

    # f32 path: exactness check. Default tile_b=512 -> megacore split to 2x256 tiles.
    out_f32 = jax.block_until_ready(ffn_forward(x, w1, b1, w2, b2))
    assert out_f32.shape == (batch, dim)
    assert jnp.allclose(out_f32, ref, atol=1e-5, rtol=1e-5)

    # bf16-I/O path: halves HBM traffic (dominant cost); compute stays f32 in-kernel.
    bf = jnp.bfloat16
    out_bf16 = jax.block_until_ready(
        ffn_forward(x.astype(bf), w1.astype(bf), b1.astype(bf),
                    w2.astype(bf), b2.astype(bf), tile_b=512))
    assert out_bf16.dtype == bf
    assert jnp.allclose(out_bf16.astype(jnp.float32), ref, atol=6e-2, rtol=6e-2)

    print("KERNEL_OK")
</pallas_src>

<mosaic_0001>
module attributes {stable_mosaic.version = 11 : i64} {
  func.func @_ffn_kernel(%arg0: i32, %arg1: memref<256x128xf32, #tpu.memory_space<vmem>>, %arg2: memref<128x8xf32, #tpu.memory_space<vmem>>, %arg3: memref<1x8xf32, #tpu.memory_space<vmem>>, %arg4: memref<8x128xf32, #tpu.memory_space<vmem>>, %arg5: memref<1x128xf32, #tpu.memory_space<vmem>>, %arg6: memref<256x128xf32, #tpu.memory_space<vmem>>) attributes {dimension_semantics = [#tpu.dimension_semantics<parallel>], iteration_bounds = array<i64: 2>, scalar_prefetch = 0 : i64, scratch_operands = 0 : i64, tpu.core_type = #tpu.core_type<tc>, window_params = [{transform_indices = @transform_0, window_bounds = array<i64: 256, 128>}, {pipeline_mode = #tpu.pipeline_mode<synchronous>, transform_indices = @transform_1, window_bounds = array<i64: 128, 8>}, {pipeline_mode = #tpu.pipeline_mode<synchronous>, transform_indices = @transform_2, window_bounds = array<i64: 1, 8>}, {pipeline_mode = #tpu.pipeline_mode<synchronous>, transform_indices = @transform_3, window_bounds = array<i64: 8, 128>}, {pipeline_mode = #tpu.pipeline_mode<synchronous>, transform_indices = @transform_4, window_bounds = array<i64: 1, 128>}, {transform_indices = @transform_5, window_bounds = array<i64: 256, 128>}]} {
    %c0 = arith.constant 0 : index
    %c0_0 = arith.constant 0 : index
    %0 = vector.load %arg1[%c0, %c0_0] : memref<256x128xf32, #tpu.memory_space<vmem>>, vector<256x128xf32>
    %c0_1 = arith.constant 0 : index
    %c0_2 = arith.constant 0 : index
    %1 = vector.load %arg2[%c0_1, %c0_2] : memref<128x8xf32, #tpu.memory_space<vmem>>, vector<128x8xf32>
    %cst = arith.constant dense<0.000000e+00> : vector<256x8xf32>
    %2 = tpu.matmul %0, %1, %cst {dimension_numbers = #tpu.dot_dimension_numbers<[1], [0], [0], [1], [0, 0, 1, 1], [], []>} : vector<256x128xf32>, vector<128x8xf32>, vector<256x8xf32> -> vector<256x8xf32>
    %c0_3 = arith.constant 0 : index
    %c0_4 = arith.constant 0 : index
    %3 = vector.load %arg3[%c0_3, %c0_4] : memref<1x8xf32, #tpu.memory_space<vmem>>, vector<1x8xf32>
    %4 = vector.broadcast %3 : vector<1x8xf32> to vector<256x8xf32>
    %5 = arith.addf %2, %4 : vector<256x8xf32>
    %6 = arith.negf %5 : vector<256x8xf32>
    %7 = math.exp %6 : vector<256x8xf32>
    %cst_5 = arith.constant 1.000000e+00 : f32
    %8 = vector.broadcast %cst_5 : f32 to vector<256x8xf32>
    %9 = arith.addf %8, %7 : vector<256x8xf32>
    %10 = arith.divf %8, %9 : vector<256x8xf32>
    %c0_6 = arith.constant 0 : index
    %c0_7 = arith.constant 0 : index
    %11 = vector.load %arg4[%c0_6, %c0_7] : memref<8x128xf32, #tpu.memory_space<vmem>>, vector<8x128xf32>
    %cst_8 = arith.constant dense<0.000000e+00> : vector<256x128xf32>
    %12 = tpu.matmul %10, %11, %cst_8 {dimension_numbers = #tpu.dot_dimension_numbers<[1], [0], [0], [1], [0, 0, 1, 1], [], []>} : vector<256x8xf32>, vector<8x128xf32>, vector<256x128xf32> -> vector<256x128xf32>
    %c0_9 = arith.constant 0 : index
    %c0_10 = arith.constant 0 : index
    %13 = vector.load %arg5[%c0_9, %c0_10] : memref<1x128xf32, #tpu.memory_space<vmem>>, vector<1x128xf32>
    %14 = vector.broadcast %13 : vector<1x128xf32> to vector<256x128xf32>
    %15 = arith.addf %12, %14 : vector<256x128xf32>
    %c0_11 = arith.constant 0 : index
    %c0_12 = arith.constant 0 : index
    %16 = vector.load %arg6[%c0_11, %c0_12] : memref<256x128xf32, #tpu.memory_space<vmem>>, vector<256x128xf32>
    tpu.vector_store %arg6[%c0_11, %c0_12], %15 {strides = array<i32>} : memref<256x128xf32, #tpu.memory_space<vmem>>, vector<256x128xf32>,
    return
  }
  func.func @transform_0(%arg0: i32) -> (i32, i32) {
    %c0_i32 = arith.constant 0 : i32
    %c0_i32_0 = arith.constant 0 : i32
    return %arg0, %c0_i32 : i32, i32
  }
  func.func @transform_1(%arg0: i32) -> (i32, i32) {
    %c0_i32 = arith.constant 0 : i32
    %c0_i32_0 = arith.constant 0 : i32
    %c0_i32_1 = arith.constant 0 : i32
    return %c0_i32, %c0_i32_0 : i32, i32
  }
  func.func @transform_2(%arg0: i32) -> (i32, i32) {
    %c0_i32 = arith.constant 0 : i32
    %c0_i32_0 = arith.constant 0 : i32
    %c0_i32_1 = arith.constant 0 : i32
    return %c0_i32, %c0_i32_0 : i32, i32
  }
  func.func @transform_3(%arg0: i32) -> (i32, i32) {
    %c0_i32 = arith.constant 0 : i32
    %c0_i32_0 = arith.constant 0 : i32
    %c0_i32_1 = arith.constant 0 : i32
    return %c0_i32, %c0_i32_0 : i32, i32
  }
  func.func @transform_4(%arg0: i32) -> (i32, i32) {
    %c0_i32 = arith.constant 0 : i32
    %c0_i32_0 = arith.constant 0 : i32
    %c0_i32_1 = arith.constant 0 : i32
    return %c0_i32, %c0_i32_0 : i32, i32
  }
  func.func @transform_5(%arg0: i32) -> (i32, i32) {
    %c0_i32 = arith.constant 0 : i32
    %c0_i32_0 = arith.constant 0 : i32
    return %arg0, %c0_i32 : i32, i32
  }
}

</mosaic_0001>

<bundles_post_ra>
// kernel: ffn_forward.1
= control target key start
LH: loop header
LB: loop body
LE: loop exit
PB: predicated region body
PF: predicated region fallthrough
CT: control target
= control target key end

     0   :  { %10 = vsyncpa [#allocation3], 0  ;;  %s2195_s0 = inlined_call_operand.hbm [shape: f32[512,128], index: 0, kind: input, shape index: {}]   ;;  %s2196_s1 = inlined_call_operand.vmem [shape: f32[128,8], index: 1, kind: input, shape index: {}]   ;;  %s2197_s2 = inlined_call_operand.vmem [shape: f32[1,8], index: 2, kind: input, shape index: {}]   ;;  %s2198_s3 = inlined_call_operand.vmem [shape: f32[8,128], index: 3, kind: input, shape index: {}]   ;;  %s2199_s4 = inlined_call_operand.vmem [shape: f32[1,128], index: 4, kind: input, shape index: {}]   ;;  %s2200_s5 = inlined_call_operand.hbm [shape: f32[512,128], index: 5, kind: output, shape index: {}]  }
   0x1   :  { %12 = vsyncpa [#allocation3 + $0x1], 0 }
   0x2   :  { %13 = vsyncpa [#allocation4], 0 }
   0x3   :  { %15 = vsyncpa [#allocation4 + $0x1], 0  ;;  %s1803_s18 = smov 0   ;;  %s1805_s19 = smov 0  }
   0x4   :  { %s1807_s20 = smov 0   ;;  %s1809_s21 = smov 0  }
   0x5 LB: > { %s1824_s22 = sadd.s32 4294967295, %s1765_s21   ;;  %s1166_s23 = sadd.s32 4294967294, %s1765_s21   ;;  %s1765_s21 = sphi %s1809_s21, %s2213_s21   ;;  %s1761_s20 = sphi %s1807_s20, %s2212_s20   ;;  %s1757_s19 = sphi %s1805_s19, %s2211_s19   ;;  %s1753_s18 = sphi %s1803_s18, %s2210_s18  }
   0x6   : > { %s1828_s24 = sadd.s32 1, %s1765_s21   ;;  %s28_s25 = sadd.s32 1, %s1761_s20 }
   0x7   : > { %s25_s26 = ssub.s32 %s1765_s21, %s1828_s24  ;;  %p35_p0 = scmp.ne.s32.totalorder %s1761_s20, %s1757_s19 }
   0x8   : > { %p26_p1 = scmp.eq.s32.totalorder %s25_s26, 0  ;;  %p36_p2 = scmp.eq.s32.totalorder %s1765_s21, 0 }
   0x9   : > { %p41_p3 = scmp.ne.s32.totalorder %s1757_s19, %s1753_s18  ;;  %p42_p4 = scmp.eq.s32.totalorder %s1824_s22, 0 }
   0xa   : > { %s1840_s27 = scalar_select %p26_p1, %s1761_s20, %s28_s25  }
   0xb   : > { %p1842_p5 = por %p36_p2, %p35_p0  ;;  %p1846_p6 = por %p42_p4, %p41_p3 }
   0xc   : > { %p149_p7 = scmp.eq.s32.totalorder %s1824_s22, 1  ;;  %p155_p8 = scmp.eq.s32.totalorder %s1166_s23, 1 }
   0xd   : > { %p1503_p10 = scmp.lt.s32.totalorder %s1765_s21, 2  ;;  %s187_s7 = sand.u32 1, %s1761_s20  }
   0xe   : > { %p1853_p11 = por %p149_p7, %p35_p0  ;;  %p1857_p12 = por %p155_p8, %p41_p3 }
   0xf   : > { %s1246_s8 = sshll.u32 %s1765_s21, 12  ;;  %s1169_s9 = sshll.u32 %s187_s7, 8 }
  0x10   : > { %s2204_s30 = scalar_select %p1853_p11, 1, 0 }
  0x11   : > { %s2205_s6 = scalar_select %p1857_p12, 1, 0 }
  0x12   : > { %s1866_s12 = scalar_lea.hbm %s2195_s0, %s1246_s8  ;;  %s191_s13 = scalar_lea.vmem [#allocation2], %s1169_s9 }
  0x13   : > { %s198_s14 = sshll.u32 %s191_s13, 4  ;;  %p1870_p13 = pnand %p1503_p10, %p1842_p5  ;;  %s1874_s14 = int_to_ptr.vmem [resolvable:$true] %s198_s14 }
  0x14   : > { %s1876_s16 = scalar_lea.sflag [#allocation3], %s187_s7  ;;  %s1669_s17 = scalar_lea.hbm %s1866_s12, 4096 }
  0x15   : > { %p1670_p0 = scmp.ne.s32.totalorder %s1866_s12, %s1669_s17  ;;  %p1671_p1 = pneg %p1870_p13 }
  0x16   : > { %s1674_s26 = scalar_lea.hbm %s2195_s0, 8192  ;;  %p1675_p4 = scmp.lt.u32.totalorder %s1866_s12, %s2195_s0 }
  0x17   : > { %p1672_p2 = pnand %p1671_p1, %p1670_p0  ;;  %p1676_p5 = scmp.lt.u32.totalorder %s1674_s26, %s1669_s17 }
  0x18   : > { %p1678_p8 = scmp.lt.u32.totalorder %s1669_s17, %s1866_s12 }
  0x19   : > { %p1673_p3 = pneg %p1672_p2  ;;  %p1677_p7 = por %p1676_p5, %p1675_p4 }
  0x1b   : > { %p1679_p10 = por %p1678_p8, %p1677_p7 }
  0x1d   : > { %p1680_p9 = pnand %p1679_p10, %p1673_p3 }
  0x1f   : > { %1683 = shalt.err (!%p1680_p9)
}
  0x20   : > { %s1684_s7 = scalar_lea.vmem %s1874_s14, 4096  ;;  %s1767_s9 = smov [#allocation2]  }
  0x21   : > { %p1685_p0 = scmp.ne.s32.totalorder %s1874_s14, %s1684_s7  ;;  %s1689_s10 = sshll.u32 %s1767_s9, 4  ;;  %s1690_s10 = int_to_ptr.vmem [resolvable:$false] %s1689_s10 }
  0x22   : > { %s1691_s11 = scalar_lea.vmem %s1690_s10, 8192  ;;  %p1692_p11 = scmp.lt.s32.totalorder %s1874_s14, %s1690_s10 }
  0x23   : > { %p1687_p2 = pnand %p1685_p0, %p1671_p1  ;;  %p1693_p4 = scmp.lt.s32.totalorder %s1691_s11, %s1684_s7 }
  0x25   : > { %p1688_p12 = pneg %p1687_p2  ;;  %p1694_p5 = por %p1693_p4, %p1692_p11 }
  0x27   : > { %p1695_p7 = pnand %p1694_p5, %p1688_p12 }
  0x29   : > { %1698 = shalt.err (!%p1695_p7)
}
  0x2a   : > { %s1768_s13 = smov 128   ;;  %s1769_s17 = smov 8  }
  0x2b   : > { %1498 = dma.hbm_to_vmem [thread:$0]  (!%p1870_p13), %s1866_s12, 4096, %s1874_s14, %s1876_s16, %s1768_s13, %s1768_s13, %s1769_s17  }
  0x2c   : > { %p1172_p9 = scmp.ge.s32.totalorder %s1765_s21, 1  ;;  %p206_p1 = scmp.lt.s32.totalorder %s1765_s21, 3 }
  0x2e   : > { %p207_p3 = pnand %p1172_p9, %p206_p1 }
  0x2f   : > { %s1907_s23 = sand.u32 (!%p207_p3), 1, %s1757_s19  }
  0x30   : > { %210 = sbr.rel (%p207_p3) target bundleno = 626 (0x272), region = 40  ;;  %s1173_s25 = sshll.u32 (!%p207_p3), %s1907_s23, 8 }
  0x31   : > { %s213_s26 = scalar_lea.sflag (!%p207_p3), [#allocation3], %s1907_s23  ;;  %s1913_s28 = scalar_lea.vmem (!%p207_p3), [#allocation2], %s1173_s25 }
  0x37   : > { %1744 = dma.done.wait (%p1846_p6), %s213_s26, 4096  }
  0x38   : > { %1746 = vsyncadd (%p1846_p6), %s213_s26, 4294963200  ;;  %v277_v0 = vld [vmem:[%s2196_s1] sm:$0xff]  ;;  %v278_v1 = vld [vmem:[%s2196_s1 + $0x8] sm:$0xff]  ;;  %vm725_vm0 = vcmask 64512   ;;  %s2080_s17 = scalar_lea.vmem [#allocation5], %s1173_s25  ;;  %s1247_s25 = sshll.u32 %s1824_s22, 12 }
  0x39   : > { %v279_v2 = vld [vmem:[%s2196_s1 + $0x10] sm:$0xff]  ;;  %v1459_v3 = vpack.c.bf16 %v278_v1, %v277_v0  ;;  %v280_v4 = vld [vmem:[%s2196_s1 + $0x18] sm:$0xff]  ;;  %v281_v6 = vld [vmem:[%s2196_s1 + $0x20] sm:$0xff]  ;;  %s1093_s26 = sshll.u32 %s2080_s17, 4  ;;  %s2146_s15 = scalar_lea.hbm %s2200_s5, %s1247_s25  ;;  %s2148_s26 = int_to_ptr.vmem [resolvable:$true] %s1093_s26 }
  0x3a   : > { %v1463_v5 = vpack.c.bf16 %v280_v4, %v279_v2  ;;  %v282_v7 = vld [vmem:[%s2196_s1 + $0x28] sm:$0xff]  ;;  %v245_v9 = vld [vmem:[%s1913_s28] sm:$0xff]  ;;  %v283_v10 = vld [vmem:[%s2196_s1 + $0x30] sm:$0xff]  ;;  %s1080_s22 = scalar_lea.sflag [#allocation4], %s1907_s23  ;;  %s1699_s16 = scalar_lea.vmem %s2148_s26, 4096 }
  0x3b   : > { %1460 = vmatprep.subr.bf16.mxu0 %v1459_v3  ;;  %v1467_v8 = vpack.c.bf16 %v282_v7, %v281_v6  ;;  %v284_v11 = vld [vmem:[%s2196_s1 + $0x38] sm:$0xff]  ;;  %1361 = vmatprep.mubr.f32.mxu0 %v245_v9  ;;  %v285_v13 = vld [vmem:[%s2196_s1 + $0x40] sm:$0xff]  ;;  %v286_v14 = vld [vmem:[%s2196_s1 + $0x48] sm:$0xff]  ;;  %p1700_p6 = scmp.ne.s32.totalorder %s2148_s26, %s1699_s16  ;;  %p2207_p11 = scmp.ne.s32.totalorder %s2204_s30, 0 }
  0x3c   : > { %1462 = vmatpush3.bf16.msra.mxu0 %v1459_v3  ;;  %v1471_v12 = vpack.c.bf16 %v284_v11, %v283_v10  ;;  %v1475_v15 = vpack.c.bf16 %v286_v14, %v285_v13  ;;  %v287_v16 = vld [vmem:[%s2196_s1 + $0x50] sm:$0xff]  ;;  %v288_v17 = vld [vmem:[%s2196_s1 + $0x58] sm:$0xff]  ;;  %v289_v19 = vld [vmem:[%s2196_s1 + $0x60] sm:$0xff]  ;;  %s1770_s8 = smov [#allocation5]  }
  0x3d   : > { %1464 = vmatprep.subr.bf16.mxu0 %v1463_v5  ;;  %v1479_v18 = vpack.c.bf16 %v288_v17, %v287_v16  ;;  %v290_v20 = vld [vmem:[%s2196_s1 + $0x68] sm:$0xff]  ;;  %v291_v22 = vld [vmem:[%s2196_s1 + $0x70] sm:$0xff]  ;;  %v292_v23 = vld [vmem:[%s2196_s1 + $0x78] sm:$0xff]  ;;  %p1701_p12 = pnand %p1700_p6, %p2207_p11  ;;  %s1703_s7 = sshll.u32 %s1770_s8, 4  ;;  %s1704_s7 = int_to_ptr.vmem [resolvable:$false] %s1703_s7 }
  0x3e   : > { %v1483_v21 = vpack.c.bf16 %v290_v20, %v289_v19  ;;  %v1487_v24 = vpack.c.bf16 %v292_v23, %v291_v22  ;;  %v246_v25 = vld [vmem:[%s1913_s28 + $0x8] sm:$0xff]  ;;  %v247_v26 = vld [vmem:[%s1913_s28 + $0x10] sm:$0xff]  ;;  %v248_v27 = vld [vmem:[%s1913_s28 + $0x18] sm:$0xff]  ;;  %s1705_s9 = scalar_lea.vmem %s1704_s7, 8192  ;;  %p1706_p8 = scmp.lt.s32.totalorder %s2148_s26, %s1704_s7 }
  0x3f   : > { %v249_v28 = vld [vmem:[%s1913_s28 + $0x20] sm:$0xff]  ;;  %v250_v29 = vld [vmem:[%s1913_s28 + $0x28] sm:$0xff]  ;;  %v251_v30 = vld [vmem:[%s1913_s28 + $0x30] sm:$0xff]  ;;  %p1702_p13 = pneg %p1701_p12  ;;  %p1707_p10 = scmp.lt.s32.totalorder %s1705_s9, %s1699_s16 }
  0x40   : > { %1466 = vmatpush3.bf16.msra.mxu0 %v1463_v5  ;;  %v252_v31 = vld [vmem:[%s1913_s28 + $0x38] sm:$0xff]  ;;  %v253_v32 = vld [vmem:[%s1913_s28 + $0x40] sm:$0xff]  ;;  %v254_v33 = vld [vmem:[%s1913_s28 + $0x48] sm:$0xff] }
  0x41   : > { %1468 = vmatprep.subr.bf16.mxu0 %v1467_v8  ;;  %v255_v34 = vld [vmem:[%s1913_s28 + $0x50] sm:$0xff]  ;;  %v256_v35 = vld [vmem:[%s1913_s28 + $0x58] sm:$0xff]  ;;  %v257_v36 = vld [vmem:[%s1913_s28 + $0x60] sm:$0xff]  ;;  %p1708_p0 = por %p1707_p10, %p1706_p8 }
  0x42   : > { %v258_v37 = vld [vmem:[%s1913_s28 + $0x68] sm:$0xff]  ;;  %v259_v38 = vld [vmem:[%s1913_s28 + $0x70] sm:$0xff]  ;;  %v260_v39 = vld [vmem:[%s1913_s28 + $0x78] sm:$0xff] }
  0x43   : > { %v261_v40 = vld [vmem:[%s1913_s28 + $0x80] sm:$0xff]  ;;  %v262_v41 = vld [vmem:[%s1913_s28 + $0x88] sm:$0xff]  ;;  %v263_v42 = vld [vmem:[%s1913_s28 + $0x90] sm:$0xff]  ;;  %p1709_p2 = pnand %p1708_p0, %p1702_p13 }
  0x44   : > { %1470 = vmatpush3.bf16.msra.mxu0 %v1467_v8  ;;  %v264_v43 = vld [vmem:[%s1913_s28 + $0x98] sm:$0xff]  ;;  %v265_v44 = vld [vmem:[%s1913_s28 + $0xa0] sm:$0xff]  ;;  %v266_v45 = vld [vmem:[%s1913_s28 + $0xa8] sm:$0xff] }
  0x45   : > { %1472 = vmatprep.subr.bf16.mxu0 %v1471_v12  ;;  %v267_v46 = vld [vmem:[%s1913_s28 + $0xb0] sm:$0xff]  ;;  %v268_v47 = vld [vmem:[%s1913_s28 + $0xb8] sm:$0xff]  ;;  %v269_v48 = vld [vmem:[%s1913_s28 + $0xc0] sm:$0xff] }
  0x46   : > { %v270_v49 = vld [vmem:[%s1913_s28 + $0xc8] sm:$0xff]  ;;  %v271_v50 = vld [vmem:[%s1913_s28 + $0xd0] sm:$0xff]  ;;  %v272_v51 = vld [vmem:[%s1913_s28 + $0xd8] sm:$0xff] }
  0x47   : > { %v273_v52 = vld [vmem:[%s1913_s28 + $0xe0] sm:$0xff]  ;;  %v274_v53 = vld [vmem:[%s1913_s28 + $0xe8] sm:$0xff]  ;;  %v275_v54 = vld [vmem:[%s1913_s28 + $0xf0] sm:$0xff] }
  0x48   : > { %1474 = vmatpush3.bf16.msra.mxu0 %v1471_v12  ;;  %v276_v55 = vld [vmem:[%s1913_s28 + $0xf8] sm:$0xff]  ;;  %v717_v56 = vld [vmem:[%s2198_s3] sm:$0xff] }
  0x49   : > { %1476 = vmatprep.subr.bf16.mxu0 %v1475_v15  ;;  %1409 = vmatprep.subr.mxu1 %v717_v56  ;;  %v2005_v57 = vld [vmem:[%s2197_s2] ss:$0 sm:$0xff] }
  0x4a   : > { %1410 = vmatpush3.msra.mxu1 %v717_v56 }
  0x4c   : > { %1478 = vmatpush3.bf16.msra.mxu0 %v1475_v15 }
  0x4d   : > { %1480 = vmatprep.subr.bf16.mxu0 %v1479_v18 }
  0x50   : > { %1482 = vmatpush3.bf16.msra.mxu0 %v1479_v18 }
  0x51   : > { %1484 = vmatprep.subr.bf16.mxu0 %v1483_v21 }
  0x54   : > { %1486 = vmatpush3.bf16.msra.mxu0 %v1483_v21 }
  0x55   : > { %1488 = vmatprep.subr.bf16.mxu0 %v1487_v24 }
  0x58   : > { %1490 = vmatpush3.bf16.msra.mxu0 %v1487_v24 }
  0x5b   : > { %1362 = vmatmul.mubr.f32.vlgmr.msra.gmra.mrb[0].mxu0 %v246_v25 }
  0x5c   : > { %1364 = vmatprep.mubr.f32.mxu0 %v247_v26 }
  0x5f   : > { %1365 = vmatmul.mubr.f32.gmra.mrb[2].mxu0 %v248_v27 }
  0x60   : > { %1367 = vmatprep.mubr.f32.mxu0 %v249_v28 }
  0x63   : > { %1368 = vmatmul.mubr.f32.gmra.mrb[4].mxu0 %v250_v29 }
  0x64   : > { %1370 = vmatprep.mubr.f32.mxu0 %v251_v30 }
  0x67   : > { %1371 = vmatmul.mubr.f32.gmra.mrb[6].mxu0 %v252_v31 }
  0x68   : > { %1373 = vmatprep.mubr.f32.mxu0 %v253_v32 }
  0x6b   : > { %1374 = vmatmul.mubr.f32.gmra.mrb[8].mxu0 %v254_v33 }
  0x6c   : > { %1376 = vmatprep.mubr.f32.mxu0 %v255_v34 }
  0x6f   : > { %1377 = vmatmul.mubr.f32.gmra.mrb[10].mxu0 %v256_v35 }
  0x70   : > { %1379 = vmatprep.mubr.f32.mxu0 %v257_v36 }
  0x73   : > { %1380 = vmatmul.mubr.f32.gmra.mrb[12].mxu0 %v258_v37 }
  0x74   : > { %1382 = vmatprep.mubr.f32.mxu0 %v259_v38 }
  0x77   : > { %1383 = vmatmul.mubr.f32.gmra.mrb[14].mxu0 %v260_v39 }
  0x78   : > { %1385 = vmatprep.mubr.f32.mxu0 %v261_v40 }
  0x7b   : > { %1386 = vmatmul.mubr.f32.gmra.mrb[16].mxu0 %v262_v41 }
  0x7c   : > { %1388 = vmatprep.mubr.f32.mxu0 %v263_v42 }
  0x7f   : > { %1389 = vmatmul.mubr.f32.gmra.mrb[18].mxu0 %v264_v43 }
  0x80   : > { %1391 = vmatprep.mubr.f32.mxu0 %v265_v44 }
  0x83   : > { %1392 = vmatmul.mubr.f32.gmra.mrb[20].mxu0 %v266_v45 }
  0x84   : > { %1394 = vmatprep.mubr.f32.mxu0 %v267_v46 }
  0x87   : > { %1395 = vmatmul.mubr.f32.gmra.mrb[22].mxu0 %v268_v47 }
  0x88   : > { %1397 = vmatprep.mubr.f32.mxu0 %v269_v48 }
  0x8b   : > { %1398 = vmatmul.mubr.f32.gmra.mrb[24].mxu0 %v270_v49 }
  0x8c   : > { %1400 = vmatprep.mubr.f32.mxu0 %v271_v50 }
  0x8f   : > { %1401 = vmatmul.mubr.f32.gmra.mrb[26].mxu0 %v272_v51 }
  0x90   : > { %1403 = vmatprep.mubr.f32.mxu0 %v273_v52 }
  0x93   : > { %1404 = vmatmul.mubr.f32.gmra.mrb[28].mxu0 %v274_v53 }
  0x94   : > { %1406 = vmatprep.mubr.f32.mxu0 %v275_v54 }
  0x97   : > { %1407 = vmatmul.mubr.f32.gmra.mrb[30].mxu0 %v276_v55 }
 0x12e   : > { %v1363_v58 = vpop.f32.mrb[0].mxu0 }
 0x12f   : > { %v372_v59 = vadd.f32 %v1363_v58, %v2005_v57  ;;  %v366_v60 = vpop.f32.mrb[1].mxu0 }
 0x130   : > { %v367_v61 = vadd.f32 %v2005_v57, %v366_v60 }
 0x131   : > { %v1177_v62 = vmul.f32 -1.442695, %v372_v59 }
 0x132   : > { %v1176_v63 = vmul.f32 -1.442695, %v367_v61  ;;  %v1366_v0 = vpop.f32.mrb[2].mxu0 }
 0x133   : > { %1541 = vpow2.f32 %v1177_v62  ;;  %v382_v1 = vadd.f32 %v1366_v0, %v2005_v57  ;;  %v376_v2 = vpop.f32.mrb[3].mxu0 }
 0x134   : > { %1543 = vpow2.f32 %v1176_v63  ;;  %v377_v3 = vadd.f32 %v2005_v57, %v376_v2 }
 0x135   : > { %v1179_v4 = vmul.f32 -1.442695, %v382_v1 }
 0x136   : > { %v1178_v5 = vmul.f32 -1.442695, %v377_v3  ;;  %v1369_v6 = vpop.f32.mrb[4].mxu0 }
 0x137   : > { %1545 = vpow2.f32 %v1179_v4  ;;  %v392_v7 = vadd.f32 %v1369_v6, %v2005_v57  ;;  %v386_v8 = vpop.f32.mrb[5].mxu0 }
 0x138   : > { %1547 = vpow2.f32 %v1178_v5  ;;  %v387_v9 = vadd.f32 %v2005_v57, %v386_v8 }
 0x139   : > { %v1181_v10 = vmul.f32 -1.442695, %v392_v7 }
 0x13a   : > { %v1180_v11 = vmul.f32 -1.442695, %v387_v9  ;;  %v1372_v12 = vpop.f32.mrb[6].mxu0 }
 0x13b   : > { %1549 = vpow2.f32 %v1181_v10  ;;  %v402_v13 = vadd.f32 %v1372_v12, %v2005_v57  ;;  %v396_v14 = vpop.f32.mrb[7].mxu0 }
 0x13c   : > { %1551 = vpow2.f32 %v1180_v11  ;;  %v397_v15 = vadd.f32 %v2005_v57, %v396_v14 }
 0x13d   : > { %v1542_v16 = vpop.eup %1541  ;;  %v1183_v17 = vmul.f32 -1.442695, %v402_v13 }
 0x13e   : > { %v1544_v18 = vpop.eup %1543  ;;  %v622_v19 = vadd.f32 1.0, %v1542_v16  ;;  %v1182_v20 = vmul.f32 -1.442695, %v397_v15  ;;  %v1375_v21 = vpop.f32.mrb[8].mxu0 }
 0x13f   : > { %v621_v22 = vadd.f32 1.0, %v1544_v18  ;;  %1553 = vpow2.f32 %v1183_v17  ;;  %v412_v23 = vadd.f32 %v1375_v21, %v2005_v57  ;;  %v406_v24 = vpop.f32.mrb[9].mxu0 }
 0x140   : > { %1555 = vrcp.f32 %v622_v19  ;;  %v407_v25 = vadd.f32 %v2005_v57, %v406_v24 }
 0x141   : > { %v1546_v26 = vpop.eup %1545  ;;  %1557 = vrcp.f32 %v621_v22  ;;  %v1185_v27 = vmul.f32 -1.442695, %v412_v23 }
 0x142   : > { %v1548_v28 = vpop.eup %1547  ;;  %v624_v29 = vadd.f32 1.0, %v1546_v26  ;;  %1559 = vpow2.f32 %v1182_v20  ;;  %v1184_v30 = vmul.f32 -1.442695, %v407_v25  ;;  %v1378_v31 = vpop.f32.mrb[10].mxu0 }
 0x143   : > { %v623_v32 = vadd.f32 1.0, %v1548_v28  ;;  %1561 = vpow2.f32 %v1185_v27  ;;  %v422_v33 = vadd.f32 %v1378_v31, %v2005_v57  ;;  %v416_v34 = vpop.f32.mrb[11].mxu0 }
 0x144   : > { %1563 = vrcp.f32 %v624_v29  ;;  %v417_v35 = vadd.f32 %v2005_v57, %v416_v34 }
 0x145   : > { %v1550_v36 = vpop.eup %1549  ;;  %1565 = vrcp.f32 %v623_v32  ;;  %v1187_v37 = vmul.f32 -1.442695, %v422_v33 }
 0x146   : > { %v1552_v38 = vpop.eup %1551  ;;  %v626_v39 = vadd.f32 1.0, %v1550_v36  ;;  %1567 = vpow2.f32 %v1184_v30  ;;  %v1186_v40 = vmul.f32 -1.442695, %v417_v35  ;;  %v1381_v41 = vpop.f32.mrb[12].mxu0 }
 0x147   : > { %v625_v42 = vadd.f32 1.0, %v1552_v38  ;;  %1569 = vpow2.f32 %v1187_v37  ;;  %v432_v43 = vadd.f32 %v1381_v41, %v2005_v57  ;;  %v426_v44 = vpop.f32.mrb[13].mxu0 }
 0x148   : > { %1571 = vrcp.f32 %v626_v39  ;;  %v427_v45 = vadd.f32 %v2005_v57, %v426_v44 }
 0x149   : > { %v1554_v46 = vpop.eup %1553  ;;  %1573 = vrcp.f32 %v625_v42  ;;  %v1189_v47 = vmul.f32 -1.442695, %v432_v43 }
 0x14a   : > { %v1556_v48 = vpop.eup %1555  ;;  %v628_v49 = vadd.f32 1.0, %v1554_v46  ;;  %1575 = vpow2.f32 %v1186_v40  ;;  %v1188_v50 = vmul.f32 -1.442695, %v427_v45  ;;  %v1384_v51 = vpop.f32.mrb[14].mxu0 }
 0x14b   : > { %v1558_v52 = vpop.eup %1557  ;;  %1577 = vpow2.f32 %v1189_v47  ;;  %v442_v53 = vadd.f32 %v1384_v51, %v2005_v57  ;;  %v436_v54 = vpop.f32.mrb[15].mxu0 }
 0x14c   : > { %v1560_v55 = vpop.eup %1559  ;;  %v437_v56 = vadd.f32 %v2005_v57, %v436_v54  ;;  %1411 = vmatprep.mubr.msk.f32.mxu1 %vm725_vm0, %v1558_v52  ;;  %1579 = vpow2.f32 %v1188_v50 }
 0x14d   : > { %v1562_v58 = vpop.eup %1561  ;;  %v627_v59 = vadd.f32 1.0, %v1560_v55  ;;  %v1191_v60 = vmul.f32 -1.442695, %v442_v53  ;;  %1412 = vmatmul.mubr.msk.f32.vlgmr.msra.gmra.mrb[0].mxu1 %vm725_vm0, %v1556_v48  ;;  %1581 = vrcp.f32 %v628_v49 }
 0x14e   : > { %v1564_v61 = vpop.eup %1563  ;;  %v630_v62 = vadd.f32 1.0, %v1562_v58  ;;  %v1190_v63 = vmul.f32 -1.442695, %v437_v56  ;;  %v1387_v0 = vpop.f32.mrb[16].mxu0 }
 0x14f   : > { %v1566_v1 = vpop.eup %1565  ;;  %1583 = vrcp.f32 %v627_v59  ;;  %v452_v2 = vadd.f32 %v1387_v0, %v2005_v57  ;;  %v446_v3 = vpop.f32.mrb[17].mxu0 }
 0x150   : > { %v1568_v4 = vpop.eup %1567  ;;  %1585 = vrcp.f32 %v630_v62  ;;  %v447_v5 = vadd.f32 %v2005_v57, %v446_v3  ;;  %1414 = vmatprep.mubr.msk.f32.mxu1 %vm725_vm0, %v1566_v1 }
 0x151   : > { %v1570_v6 = vpop.eup %1569  ;;  %v629_v7 = vadd.f32 1.0, %v1568_v4  ;;  %1587 = vpow2.f32 %v1191_v60  ;;  %v1193_v8 = vmul.f32 -1.442695, %v452_v2  ;;  %1415 = vmatmul.mubr.msk.f32.gmra.mrb[2].mxu1 %vm725_vm0, %v1564_v61 }
 0x152   : > { %v1572_v9 = vpop.eup %1571  ;;  %v632_v10 = vadd.f32 1.0, %v1570_v6  ;;  %1589 = vpow2.f32 %v1190_v63  ;;  %v1192_v11 = vmul.f32 -1.442695, %v447_v5  ;;  %v1390_v12 = vpop.f32.mrb[18].mxu0 }
 0x153   : > { %v1574_v13 = vpop.eup %1573  ;;  %1591 = vrcp.f32 %v629_v7  ;;  %v462_v14 = vadd.f32 %v1390_v12, %v2005_v57  ;;  %v456_v15 = vpop.f32.mrb[19].mxu0 }
 0x154   : > { %v1576_v16 = vpop.eup %1575  ;;  %1593 = vrcp.f32 %v632_v10  ;;  %v457_v17 = vadd.f32 %v2005_v57, %v456_v15  ;;  %1417 = vmatprep.mubr.msk.f32.mxu1 %vm725_vm0, %v1574_v13 }
 0x155   : > { %v1578_v18 = vpop.eup %1577  ;;  %v631_v19 = vadd.f32 1.0, %v1576_v16  ;;  %1595 = vpow2.f32 %v1193_v8  ;;  %v1195_v20 = vmul.f32 -1.442695, %v462_v14  ;;  %1418 = vmatmul.mubr.msk.f32.gmra.mrb[4].mxu1 %vm725_vm0, %v1572_v9 }
 0x156   : > { %v634_v21 = vadd.f32 1.0, %v1578_v18  ;;  %1597 = vpow2.f32 %v1192_v11  ;;  %v1393_v22 = vpop.f32.mrb[20].mxu0  ;;  %v1580_v23 = vpop.eup %1579  ;;  %v1194_v24 = vmul.f32 -1.442695, %v457_v17 }
 0x157   : > { %1599 = vrcp.f32 %v631_v19  ;;  %v472_v25 = vadd.f32 %v1393_v22, %v2005_v57  ;;  %v466_v26 = vpop.f32.mrb[21].mxu0  ;;  %v1582_v27 = vpop.eup %1581  ;;  %v633_v28 = vadd.f32 1.0, %v1580_v23 }
 0x158   : > { %1601 = vrcp.f32 %v634_v21  ;;  %v467_v29 = vadd.f32 %v2005_v57, %v466_v26 }
 0x159   : > { %v1584_v30 = vpop.eup %1583  ;;  %1603 = vpow2.f32 %v1195_v20  ;;  %v1197_v31 = vmul.f32 -1.442695, %v472_v25 }
 0x15a   : > { %v1586_v32 = vpop.eup %1585  ;;  %1605 = vrcp.f32 %v633_v28  ;;  %v1196_v33 = vmul.f32 -1.442695, %v467_v29  ;;  %1420 = vmatprep.mubr.msk.f32.mxu1 %vm725_vm0, %v1584_v30  ;;  %v1396_v34 = vpop.f32.mrb[22].mxu0 }
 0x15b   : > { %v1588_v35 = vpop.eup %1587  ;;  %1607 = vpow2.f32 %v1194_v24  ;;  %1421 = vmatmul.mubr.msk.f32.gmra.mrb[6].mxu1 %vm725_vm0, %v1582_v27  ;;  %v482_v36 = vadd.f32 %v1396_v34, %v2005_v57  ;;  %v476_v37 = vpop.f32.mrb[23].mxu0 }
 0x15c   : > { %v1590_v38 = vpop.eup %1589  ;;  %v636_v39 = vadd.f32 1.0, %v1588_v35  ;;  %1609 = vpow2.f32 %v1197_v31  ;;  %v477_v40 = vadd.f32 %v2005_v57, %v476_v37 }
 0x15d   : > { %v1592_v41 = vpop.eup %1591  ;;  %v635_v42 = vadd.f32 1.0, %v1590_v38  ;;  %1611 = vpow2.f32 %v1196_v33  ;;  %v1199_v43 = vmul.f32 -1.442695, %v482_v36 }
 0x15e   : > { %v1594_v44 = vpop.eup %1593  ;;  %1613 = vrcp.f32 %v636_v39  ;;  %v1198_v45 = vmul.f32 -1.442695, %v477_v40  ;;  %1423 = vmatprep.mubr.msk.f32.mxu1 %vm725_vm0, %v1592_v41  ;;  %v1399_v46 = vpop.f32.mrb[24].mxu0 }
 0x15f   : > { %v1596_v47 = vpop.eup %1595  ;;  %1615 = vrcp.f32 %v635_v42  ;;  %1424 = vmatmul.mubr.msk.f32.gmra.mrb[8].mxu1 %vm725_vm0, %v1586_v32  ;;  %v492_v48 = vadd.f32 %v1399_v46, %v2005_v57  ;;  %v486_v49 = vpop.f32.mrb[25].mxu0 }
 0x160   : > { %v1598_v50 = vpop.eup %1597  ;;  %v638_v51 = vadd.f32 1.0, %v1596_v47  ;;  %1617 = vpow2.f32 %v1199_v43  ;;  %v487_v52 = vadd.f32 %v2005_v57, %v486_v49 }
 0x161   : > { %v1600_v53 = vpop.eup %1599  ;;  %v637_v54 = vadd.f32 1.0, %v1598_v50  ;;  %1619 = vpow2.f32 %v1198_v45  ;;  %v1201_v55 = vmul.f32 -1.442695, %v492_v48 }
 0x162   : > { %v1602_v56 = vpop.eup %1601  ;;  %1621 = vrcp.f32 %v638_v51  ;;  %v1200_v58 = vmul.f32 -1.442695, %v487_v52  ;;  %1426 = vmatprep.mubr.msk.f32.mxu1 %vm725_vm0, %v1600_v53  ;;  %v1402_v59 = vpop.f32.mrb[26].mxu0 }
 0x163   : > { %v1604_v60 = vpop.eup %1603  ;;  %1623 = vrcp.f32 %v637_v54  ;;  %1427 = vmatmul.mubr.msk.f32.gmra.mrb[10].mxu1 %vm725_vm0, %v1594_v44  ;;  %v502_v61 = vadd.f32 %v1402_v59, %v2005_v57  ;;  %v496_v62 = vpop.f32.mrb[27].mxu0 }
 0x164   : > { %v1606_v63 = vpop.eup %1605  ;;  %1625 = vpow2.f32 %v1201_v55  ;;  %v497_v0 = vadd.f32 %v2005_v57, %v496_v62  ;;  %v640_v2 = vadd.f32 1.0, %v1604_v60  ;;  %v2074_v60 = vld [vmem:[%s2199_s4] ss:$0 sm:$0xff] }
 0x165   : > { %v1608_v1 = vpop.eup %1607  ;;  %1627 = vpow2.f32 %v1200_v58  ;;  %v1203_v3 = vmul.f32 -1.442695, %v502_v61  ;;  %1429 = vmatprep.mubr.msk.f32.mxu1 %vm725_vm0, %v1606_v63 }
 0x166   : > { %v1610_v4 = vpop.eup %1609  ;;  %v639_v5 = vadd.f32 1.0, %v1608_v1  ;;  %v1405_v6 = vpop.f32.mrb[28].mxu0  ;;  %v1202_v8 = vmul.f32 -1.442695, %v497_v0 }
 0x167   : > { %v1612_v7 = vpop.eup %1611  ;;  %1629 = vpow2.f32 %v1203_v3  ;;  %1430 = vmatmul.mubr.msk.f32.gmra.mrb[12].mxu1 %vm725_vm0, %v1602_v56  ;;  %v512_v9 = vadd.f32 %v1405_v6, %v2005_v57  ;;  %v506_v10 = vpop.f32.mrb[29].mxu0  ;;  %v642_v15 = vadd.f32 1.0, %v1610_v4 }
 0x168   : > { %v1614_v11 = vpop.eup %1613  ;;  %1631 = vrcp.f32 %v639_v5  ;;  %v641_v12 = vadd.f32 1.0, %v1612_v7  ;;  %v507_v13 = vadd.f32 %v2005_v57, %v506_v10 }
 0x169   : > { %v1616_v14 = vpop.eup %1615  ;;  %1633 = vrcp.f32 %v640_v2  ;;  %v1205_v16 = vmul.f32 -1.442695, %v512_v9 }
 0x16a   : > { %v1618_v17 = vpop.eup %1617  ;;  %1635 = vrcp.f32 %v641_v12  ;;  %1432 = vmatprep.mubr.msk.f32.mxu1 %vm725_vm0, %v1616_v14  ;;  %v1408_v18 = vpop.f32.mrb[30].mxu0  ;;  %v1204_v20 = vmul.f32 -1.442695, %v507_v13 }
 0x16b   : > { %v1620_v19 = vpop.eup %1619  ;;  %1637 = vpow2.f32 %v1202_v8  ;;  %1433 = vmatmul.mubr.msk.f32.gmra.mrb[14].mxu1 %vm725_vm0, %v1614_v11  ;;  %v522_v21 = vadd.f32 %v1408_v18, %v2005_v57  ;;  %v516_v22 = vpop.f32.mrb[31].mxu0  ;;  %v644_v27 = vadd.f32 1.0, %v1618_v17 }
 0x16c   : > { %v1622_v23 = vpop.eup %1621  ;;  %v643_v24 = vadd.f32 1.0, %v1620_v19  ;;  %1639 = vpow2.f32 %v1205_v16  ;;  %v517_v25 = vadd.f32 %v2005_v57, %v516_v22 }
 0x16d   : > { %v1624_v26 = vpop.eup %1623  ;;  %1641 = vrcp.f32 %v642_v15  ;;  %v1207_v28 = vmul.f32 -1.442695, %v522_v21 }
 0x16e   : > { %v1626_v29 = vpop.eup %1625  ;;  %1643 = vrcp.f32 %v643_v24  ;;  %1435 = vmatprep.mubr.msk.f32.mxu1 %vm725_vm0, %v1624_v26  ;;  %v1206_v31 = vmul.f32 -1.442695, %v517_v25 }
 0x16f   : > { %v1628_v30 = vpop.eup %1627  ;;  %1645 = vpow2.f32 %v1204_v20  ;;  %1436 = vmatmul.mubr.msk.f32.gmra.mrb[16].mxu1 %vm725_vm0, %v1622_v23  ;;  %v646_v34 = vadd.f32 1.0, %v1626_v29 }
 0x170   : > { %v645_v32 = vadd.f32 1.0, %v1628_v30  ;;  %1647 = vpow2.f32 %v1207_v28 }
 0x171   : > { %v1630_v33 = vpop.eup %1629  ;;  %1649 = vrcp.f32 %v644_v27 }
 0x172   : > { %v1632_v35 = vpop.eup %1631  ;;  %1651 = vrcp.f32 %v645_v32  ;;  %v648_v38 = vadd.f32 1.0, %v1630_v33 }
 0x173   : > { %v1634_v57 = vpop.eup %1633  ;;  %1653 = vpow2.f32 %v1206_v31  ;;  %1438 = vmatprep.mubr.msk.f32.mxu1 %vm725_vm0, %v1632_v35 }
 0x174   : > { %v1636_v36 = vpop.eup %1635  ;;  %1439 = vmatmul.mubr.msk.f32.gmra.mrb[18].mxu1 %vm725_vm0, %v1634_v57  ;;  %1655 = vrcp.f32 %v646_v34 }
 0x175   : > { %v1638_v37 = vpop.eup %1637  ;;  %1441 = vmatprep.mubr.msk.f32.mxu1 %vm725_vm0, %v1636_v36 }
 0x176   : > { %v1640_v39 = vpop.eup %1639  ;;  %v647_v40 = vadd.f32 1.0, %v1638_v37 }
 0x177   : > { %v1642_v41 = vpop.eup %1641  ;;  %v650_v44 = vadd.f32 1.0, %v1640_v39 }
 0x178   : > { %v1644_v42 = vpop.eup %1643  ;;  %1657 = vrcp.f32 %v647_v40  ;;  %1442 = vmatmul.mubr.msk.f32.gmra.mrb[20].mxu1 %vm725_vm0, %v1642_v41 }
 0x179   : > { %v1646_v43 = vpop.eup %1645  ;;  %1659 = vrcp.f32 %v648_v38  ;;  %1444 = vmatprep.mubr.msk.f32.mxu1 %vm725_vm0, %v1644_v42 }
 0x17a   : > { %v1648_v45 = vpop.eup %1647  ;;  %v649_v46 = vadd.f32 1.0, %v1646_v43 }
 0x17b   : > { %v1650_v47 = vpop.eup %1649  ;;  %v652_v50 = vadd.f32 1.0, %v1648_v45 }
 0x17c   : > { %v1652_v48 = vpop.eup %1651  ;;  %1661 = vrcp.f32 %v649_v46  ;;  %1445 = vmatmul.mubr.msk.f32.gmra.mrb[22].mxu1 %vm725_vm0, %v1650_v47 }
 0x17d   : > { %v1654_v49 = vpop.eup %1653  ;;  %1663 = vrcp.f32 %v650_v44  ;;  %1447 = vmatprep.mubr.msk.f32.mxu1 %vm725_vm0, %v1652_v48 }
 0x17e   : > { %v651_v51 = vadd.f32 1.0, %v1654_v49  ;;  %v1656_v52 = vpop.eup %1655 }
 0x180   : > { %1665 = vrcp.f32 %v651_v51  ;;  %1448 = vmatmul.mubr.msk.f32.gmra.mrb[24].mxu1 %vm725_vm0, %v1656_v52 }
 0x181   : > { %1667 = vrcp.f32 %v652_v50 }
 0x182   : > { %v1658_v53 = vpop.eup %1657 }
 0x183   : > { %v1660_v54 = vpop.eup %1659  ;;  %1450 = vmatprep.mubr.msk.f32.mxu1 %vm725_vm0, %v1658_v53 }
 0x184   : > { %1451 = vmatmul.mubr.msk.f32.gmra.mrb[26].mxu1 %vm725_vm0, %v1660_v54 }
 0x186   : > { %v1662_v55 = vpop.eup %1661 }
 0x187   : > { %v1664_v56 = vpop.eup %1663  ;;  %1453 = vmatprep.mubr.msk.f32.mxu1 %vm725_vm0, %v1662_v55 }
 0x188   : > { %1454 = vmatmul.mubr.msk.f32.gmra.mrb[28].mxu1 %vm725_vm0, %v1664_v56 }
 0x18a   : > { %v1666_v58 = vpop.eup %1665 }
 0x18b   : > { %v1668_v59 = vpop.eup %1667  ;;  %1456 = vmatprep.mubr.msk.f32.mxu1 %vm725_vm0, %v1666_v58 }
 0x18c   : > { %1457 = vmatmul.mubr.msk.f32.gmra.mrb[30].mxu1 %vm725_vm0, %v1668_v59 }
 0x220   : > { %v1413_v61 = vpop.f32.mrb[0].mxu1 }
 0x221   : > { %v894_v62 = vadd.f32 %v1413_v61, %v2074_v60  ;;  %v888_v63 = vpop.f32.mrb[1].mxu1 }
 0x222   : > { %v889_v0 = vadd.f32 %v2074_v60, %v888_v63 }
 0x223   : > { %1048 = vst [vmem:[%s2080_s17 + $0x8] sm:$0xff] %v894_v62 }
 0x224   : > { %1047 = vst [vmem:[%s2080_s17] sm:$0xff] %v889_v0  ;;  %v1416_v1 = vpop.f32.mrb[2].mxu1 }
 0x225   : > { %v904_v2 = vadd.f32 %v1416_v1, %v2074_v60  ;;  %v898_v3 = vpop.f32.mrb[3].mxu1 }
 0x226   : > { %v899_v4 = vadd.f32 %v2074_v60, %v898_v3 }
 0x227   : > { %1050 = vst [vmem:[%s2080_s17 + $0x18] sm:$0xff] %v904_v2 }
 0x228   : > { %1049 = vst [vmem:[%s2080_s17 + $0x10] sm:$0xff] %v899_v4  ;;  %v1419_v5 = vpop.f32.mrb[4].mxu1 }
 0x229   : > { %v914_v6 = vadd.f32 %v1419_v5, %v2074_v60  ;;  %v908_v7 = vpop.f32.mrb[5].mxu1 }
 0x22a   : > { %v909_v8 = vadd.f32 %v2074_v60, %v908_v7 }
 0x22b   : > { %1052 = vst [vmem:[%s2080_s17 + $0x28] sm:$0xff] %v914_v6 }
 0x22c   : > { %1051 = vst [vmem:[%s2080_s17 + $0x20] sm:$0xff] %v909_v8 }
 0x22e   : > { %v1422_v9 = vpop.f32.mrb[6].mxu1 }
 0x22f   : > { %v924_v10 = vadd.f32 %v1422_v9, %v2074_v60  ;;  %v918_v11 = vpop.f32.mrb[7].mxu1 }
 0x230   : > { %v919_v12 = vadd.f32 %v2074_v60, %v918_v11 }
 0x231   : > { %1054 = vst [vmem:[%s2080_s17 + $0x38] sm:$0xff] %v924_v10 }
 0x232   : > { %1053 = vst [vmem:[%s2080_s17 + $0x30] sm:$0xff] %v919_v12  ;;  %v1425_v13 = vpop.f32.mrb[8].mxu1 }
 0x233   : > { %v934_v14 = vadd.f32 %v1425_v13, %v2074_v60  ;;  %v928_v15 = vpop.f32.mrb[9].mxu1 }
 0x234   : > { %v929_v16 = vadd.f32 %v2074_v60, %v928_v15 }
 0x235   : > { %1056 = vst [vmem:[%s2080_s17 + $0x48] sm:$0xff] %v934_v14 }
 0x236   : > { %1055 = vst [vmem:[%s2080_s17 + $0x40] sm:$0xff] %v929_v16  ;;  %v1428_v17 = vpop.f32.mrb[10].mxu1 }
 0x237   : > { %v944_v18 = vadd.f32 %v1428_v17, %v2074_v60  ;;  %v938_v19 = vpop.f32.mrb[11].mxu1 }
 0x238   : > { %v939_v20 = vadd.f32 %v2074_v60, %v938_v19 }
 0x239   : > { %1058 = vst [vmem:[%s2080_s17 + $0x58] sm:$0xff] %v944_v18 }
 0x23a   : > { %1057 = vst [vmem:[%s2080_s17 + $0x50] sm:$0xff] %v939_v20  ;;  %v1431_v21 = vpop.f32.mrb[12].mxu1 }
 0x23b   : > { %v954_v22 = vadd.f32 %v1431_v21, %v2074_v60  ;;  %v948_v23 = vpop.f32.mrb[13].mxu1 }
 0x23c   : > { %v949_v24 = vadd.f32 %v2074_v60, %v948_v23 }
 0x23d   : > { %1060 = vst [vmem:[%s2080_s17 + $0x68] sm:$0xff] %v954_v22 }
 0x23e   : > { %1059 = vst [vmem:[%s2080_s17 + $0x60] sm:$0xff] %v949_v24  ;;  %v1434_v25 = vpop.f32.mrb[14].mxu1 }
 0x23f   : > { %v964_v26 = vadd.f32 %v1434_v25, %v2074_v60  ;;  %v958_v27 = vpop.f32.mrb[15].mxu1 }
 0x240   : > { %v959_v28 = vadd.f32 %v2074_v60, %v958_v27 }
 0x241   : > { %1062 = vst [vmem:[%s2080_s17 + $0x78] sm:$0xff] %v964_v26 }
 0x242   : > { %1061 = vst [vmem:[%s2080_s17 + $0x70] sm:$0xff] %v959_v28  ;;  %v1437_v29 = vpop.f32.mrb[16].mxu1 }
 0x243   : > { %v974_v30 = vadd.f32 %v1437_v29, %v2074_v60  ;;  %v968_v31 = vpop.f32.mrb[17].mxu1 }
 0x244   : > { %v969_v32 = vadd.f32 %v2074_v60, %v968_v31 }
 0x245   : > { %1064 = vst [vmem:[%s2080_s17 + $0x88] sm:$0xff] %v974_v30 }
 0x246   : > { %1063 = vst [vmem:[%s2080_s17 + $0x80] sm:$0xff] %v969_v32 }
 0x247   : > { %v1440_v33 = vpop.f32.mrb[18].mxu1 }
 0x248   : > { %v984_v34 = vadd.f32 %v1440_v33, %v2074_v60  ;;  %v978_v35 = vpop.f32.mrb[19].mxu1 }
 0x249   : > { %v979_v57 = vadd.f32 %v2074_v60, %v978_v35 }
 0x24a   : > { %1066 = vst [vmem:[%s2080_s17 + $0x98] sm:$0xff] %v984_v34 }
 0x24b   : > { %1065 = vst [vmem:[%s2080_s17 + $0x90] sm:$0xff] %v979_v57  ;;  %v1443_v36 = vpop.f32.mrb[20].mxu1 }
 0x24c   : > { %v994_v37 = vadd.f32 %v1443_v36, %v2074_v60  ;;  %v988_v38 = vpop.f32.mrb[21].mxu1 }
 0x24d   : > { %v989_v39 = vadd.f32 %v2074_v60, %v988_v38 }
 0x24e   : > { %1068 = vst [vmem:[%s2080_s17 + $0xa8] sm:$0xff] %v994_v37 }
 0x24f   : > { %1067 = vst [vmem:[%s2080_s17 + $0xa0] sm:$0xff] %v989_v39  ;;  %v1446_v40 = vpop.f32.mrb[22].mxu1 }
 0x250   : > { %v1004_v41 = vadd.f32 %v1446_v40, %v2074_v60  ;;  %v998_v42 = vpop.f32.mrb[23].mxu1 }
 0x251   : > { %v999_v43 = vadd.f32 %v2074_v60, %v998_v42 }
 0x252   : > { %1070 = vst [vmem:[%s2080_s17 + $0xb8] sm:$0xff] %v1004_v41 }
 0x253   : > { %1069 = vst [vmem:[%s2080_s17 + $0xb0] sm:$0xff] %v999_v43  ;;  %v1449_v44 = vpop.f32.mrb[24].mxu1 }
 0x254   : > { %v1014_v45 = vadd.f32 %v1449_v44, %v2074_v60  ;;  %v1008_v46 = vpop.f32.mrb[25].mxu1 }
 0x255   : > { %v1009_v47 = vadd.f32 %v2074_v60, %v1008_v46 }
 0x256   : > { %1072 = vst [vmem:[%s2080_s17 + $0xc8] sm:$0xff] %v1014_v45 }
 0x257   : > { %1071 = vst [vmem:[%s2080_s17 + $0xc0] sm:$0xff] %v1009_v47  ;;  %v1452_v48 = vpop.f32.mrb[26].mxu1 }
 0x258   : > { %v1024_v49 = vadd.f32 %v1452_v48, %v2074_v60  ;;  %v1018_v50 = vpop.f32.mrb[27].mxu1 }
 0x259   : > { %v1019_v51 = vadd.f32 %v2074_v60, %v1018_v50 }
 0x25a   : > { %1074 = vst [vmem:[%s2080_s17 + $0xd8] sm:$0xff] %v1024_v49 }
 0x25b   : > { %1073 = vst [vmem:[%s2080_s17 + $0xd0] sm:$0xff] %v1019_v51  ;;  %v1455_v52 = vpop.f32.mrb[28].mxu1 }
 0x25c   : > { %v1034_v53 = vadd.f32 %v1455_v52, %v2074_v60  ;;  %v1028_v54 = vpop.f32.mrb[29].mxu1 }
 0x25d   : > { %v1029_v55 = vadd.f32 %v2074_v60, %v1028_v54 }
 0x25e   : > { %1076 = vst [vmem:[%s2080_s17 + $0xe8] sm:$0xff] %v1034_v53 }
 0x25f   : > { %1075 = vst [vmem:[%s2080_s17 + $0xe0] sm:$0xff] %v1029_v55  ;;  %v1458_v56 = vpop.f32.mrb[30].mxu1 }
 0x260   : > { %v1044_v58 = vadd.f32 %v1458_v56, %v2074_v60  ;;  %v1038_v59 = vpop.f32.mrb[31].mxu1 }
 0x261   : > { %v1039_v61 = vadd.f32 %v2074_v60, %v1038_v59 }
 0x262   : > { %1078 = vst [vmem:[%s2080_s17 + $0xf8] sm:$0xff] %v1044_v58 }
 0x263   : > { %1077 = vst [vmem:[%s2080_s17 + $0xf0] sm:$0xff] %v1039_v61 }
 0x264   : > { %1712 = shalt.err (!%p1709_p2)
}
 0x265   : > { %s1713_s10 = scalar_lea.hbm %s2146_s15, 4096  ;;  %s1717_s28 = scalar_lea.hbm %s2200_s5, 8192 }
 0x266   : > { %p1714_p4 = scmp.ne.s32.totalorder %s2146_s15, %s1713_s10  ;;  %p1718_p9 = scmp.lt.u32.totalorder %s2146_s15, %s2200_s5 }
 0x267   : > { %p1719_p1 = scmp.lt.u32.totalorder %s1717_s28, %s1713_s10  ;;  %p1721_p6 = scmp.lt.u32.totalorder %s1713_s10, %s2146_s15 }
 0x268   : > { %p1715_p5 = pnand %p1714_p4, %p2207_p11 }
 0x269   : > { %p1720_p3 = por %p1719_p1, %p1718_p9 }
 0x26a   : > { %p1716_p7 = pneg %p1715_p5 }
 0x26b   : > { %p1722_p12 = por %p1721_p6, %p1720_p3 }
 0x26d   : > { %p1723_p13 = pnand %p1722_p12, %p1716_p7 }
 0x26f   : > { %1726 = shalt.err (!%p1723_p13)
}
 0x270   : > { %s1771_s25 = smov 128   ;;  %s1772_s12 = smov 8  }
 0x271   : > { %1493 = dma.vmem_to_hbm [thread:$0]  (%p2207_p11), %s2148_s26, 4096, %s2146_s15, %s1080_s22, %s1771_s25, %s1771_s25, %s1772_s12  }
 0x272 PF: > { %s1108_s14 = sand.u32 1, %s1753_s18   ;;  %p2208_p8 = scmp.ne.s32.totalorder %s2205_s6, 0 }
 0x273   : > { %p2209_p10 = scmp.ge.s32.totalorder %s1765_s21, 2  ;;  %s1109_s16 = scalar_lea.sflag [#allocation4], %s1108_s14 }
 0x275   : > { %p1500_p0 = pnand %p2209_p10, %p2208_p8 }
 0x277   : > { %1748 = dma.done.wait (!%p1500_p0), %s1109_s16, 4096  }
 0x278   : > { %1750 = vsyncadd (!%p1500_p0), %s1109_s16, 4294963200  ;;  %p18_p2 = scmp.ge.s32.totalorder %s1828_s24, 4   ;;  %s2210_s18 = smov %s1757_s19 }
 0x279   : > { %s2211_s19 = smov %s1761_s20  ;;  %s2212_s20 = smov %s1840_s27 }
 0x27a   : > { %s2213_s21 = smov %s1828_s24  ;;  %20 = sbr.rel (!%p18_p2) target bundleno = 5 (0x5), region = 85 }
 0x281   :  { %1114 = vsyncpa [#allocation3], 1 }
 0x282   :  { %1116 = vsyncpa [#allocation3 + $0x1], 1 }
 0x283   :  { %1117 = vsyncpa [#allocation4], 1 }
 0x284   :  { %1119 = vsyncpa [#allocation4 + $0x1], 1 }

</bundles_post_ra>
